<compile_context>
chip_gen: v7x
topology: tpu7x:2x2x1
jax: 0.10.0
libtpu: 0.0.40
codegen_flags: <defaults>
</compile_context>

<pallas_src>
import functools

import jax
import jax.numpy as jnp
import numpy as np
from jax.experimental import pallas as pl
from jax.experimental.pallas import tpu as pltpu

LEAKY_SLOPE = 0.2
BN_EPS = 1e-5
# Set to jnp.bfloat16 for native MXU throughput (accumulation stays f32).
MXU_INPUT_DTYPE = jnp.float32

_COMPILER_PARAMS = pltpu.CompilerParams(
    dimension_semantics=("parallel",),     # shard row tiles across TCs
    vmem_limit_bytes=32 * 1024 * 1024,     # fits v5e/v6e (128 MiB) and v7x (64 MiB)
)

_FUSED_BN_VMEM_BUDGET = 20 * 1024 * 1024   # bytes; gate for single-tile BN path


def _round8(n: int) -> int:
    return max(8, ((n + 7) // 8) * 8)


def _pick_row_tile(n_rows: int, max_c: int) -> int:
    """Whole (8-rounded) batch when small; otherwise the largest 128-multiple
    tile whose double-buffered in/out activation streams fit ~8 MiB."""
    if n_rows <= 512:
        return _round8(n_rows)
    per_row = 2 * 2 * max(max_c, 1) * 4            # in+out streams, 2 buffers, f32
    tm = (8 * 1024 * 1024 // per_row) // 128 * 128
    return int(min(4096, max(512, tm)))


def _row_spec(tm, c):
    return pl.BlockSpec((tm, c), lambda i: (i, 0))


def _resident_spec(shape):
    nd = len(shape)
    return pl.BlockSpec(shape, lambda i: (0,) * nd)


# ----------------------------- kernels ------------------------------------


def _leaky_relu(h):
    # max(h, 0.2*h): one vmul + vmax instead of compare + mul + select.
    return jnp.maximum(h, LEAKY_SLOPE * h)


def _masked_stats(h, tile_idx, n_rows, row_tile, sum_ref, ssq_ref):
    """Per-tile partial sum / sum-of-squares, masking padded rows of a partial
    final tile so full-batch BN statistics stay exact."""
    row = jax.lax.broadcasted_iota(jnp.int32, h.shape, 0)
    hm = jnp.where(row < (n_rows - tile_idx * row_tile), h, 0.0)
    sum_ref[0] = jnp.sum(hm, axis=0, keepdims=True)
    ssq_ref[0] = jnp.sum(hm * hm, axis=0, keepdims=True)


def _linear_stats_kernel(x_ref, w_ref, h_ref, sum_ref, ssq_ref, *,
                         n_rows, row_tile):
    """First layer under BN: h = x @ W (bias dropped; BN cancels it)."""
    h = jnp.dot(x_ref[...].astype(MXU_INPUT_DTYPE), w_ref[...],
                preferred_element_type=jnp.float32)
    h_ref[...] = h.astype(h_ref.dtype)
    _masked_stats(h, pl.program_id(0), n_rows, row_tile, sum_ref, ssq_ref)


def _bn_act_linear_stats_kernel(h_ref, scale_ref, shift_ref, w_ref,
                                o_ref, sum_ref, ssq_ref, *, n_rows, row_tile):
    """Middle layer: o = leaky_relu(h*scale + shift) @ W   (+ partial stats)."""
    a = _leaky_relu(h_ref[...] * scale_ref[...] + shift_ref[...])
    o = jnp.dot(a.astype(MXU_INPUT_DTYPE), w_ref[...],
                preferred_element_type=jnp.float32)
    o_ref[...] = o.astype(o_ref.dtype)
    _masked_stats(o, pl.program_id(0), n_rows, row_tile, sum_ref, ssq_ref)


def _bn_act_linear_bias_kernel(h_ref, scale_ref, shift_ref, w_ref, b_ref, o_ref):
    """Final layer: o = leaky_relu(h*scale + shift) @ W + b."""
    a = _leaky_relu(h_ref[...] * scale_ref[...] + shift_ref[...])
    o = jnp.dot(a.astype(MXU_INPUT_DTYPE), w_ref[...],
                preferred_element_type=jnp.float32) + b_ref[...]
    o_ref[...] = o.astype(o_ref.dtype)


def _make_fused_nobn_kernel(num_layers):
    """bn=False: the whole MLP fused into one kernel per row tile."""
    def kernel(*refs):
        h = refs[0][...].astype(jnp.float32)
        idx = 1
        for i in range(num_layers):
            w = refs[idx][...]
            b = refs[idx + 1][...]
            idx += 2
            h = jnp.dot(h.astype(MXU_INPUT_DTYPE), w,
                        preferred_element_type=jnp.float32) + b
            if i != num_layers - 1:
                h = _leaky_relu(h)
        out_ref = refs[idx]
        out_ref[...] = h.astype(out_ref.dtype)
    return kernel


def _make_fused_bn_kernel(num_layers, n_rows):
    """bn=True, single-tile: whole batch lives in VMEM, so exact train-mode
    BatchNorm batch statistics are computed in-kernel (one-pass, masked for the
    8-rounded padded rows).  Hidden Linear biases dropped (BN cancels them)."""
    def kernel(*refs):
        h = refs[0][...].astype(jnp.float32)
        idx = 1
        for i in range(num_layers):
            w = refs[idx][...]
            idx += 1
            h = jnp.dot(h.astype(MXU_INPUT_DTYPE), w,
                        preferred_element_type=jnp.float32)
            if i != num_layers - 1:
                gamma = refs[idx][...]
                beta = refs[idx + 1][...]
                idx += 2
                row = jax.lax.broadcasted_iota(jnp.int32, h.shape, 0)
                hm = jnp.where(row < n_rows, h, 0.0)           # mask padded rows
                inv_n = 1.0 / n_rows
                mean = jnp.sum(hm, axis=0, keepdims=True) * inv_n
                var = jnp.maximum(
                    jnp.sum(hm * hm, axis=0, keepdims=True) * inv_n - mean * mean,
                    0.0)                                        # biased var (train mode)
                scale = gamma * jax.lax.rsqrt(var + BN_EPS)
                h = _leaky_relu((h - mean) * scale + beta)
            else:
                h = h + refs[idx][...]                          # final-layer bias
                idx += 1
        out_ref = refs[idx]
        out_ref[...] = h.astype(out_ref.dtype)
    return kernel


# ----------------------------- wrappers ------------------------------------


def prepare_params(weights, biases, gammas, betas, *, bn):
    """One-time layout prep (per parameter update, NOT per forward call):
    transpose Linear weights to (C_in, C_out) for `h @ W` on the MXU, cast to
    the MXU input dtype, and reshape per-channel vectors to (1, C)."""
    num_layers = len(weights)
    params = {
        "w_t": [jnp.transpose(w).astype(MXU_INPUT_DTYPE) for w in weights],
        "b": [b.reshape(1, -1).astype(jnp.float32) for b in biases],
        "gamma": [],
        "beta": [],
    }
    if bn:
        params["gamma"] = [g.reshape(1, -1).astype(jnp.float32)
                           for g in gammas[: num_layers - 1]]
        params["beta"] = [bt.reshape(1, -1).astype(jnp.float32)
                          for bt in betas[: num_layers - 1]]
    return params


def _forward_no_bn(x, w_ts, bs, tm):
    n, c_in = x.shape
    grid = (pl.cdiv(n, tm),)
    in_specs = [_row_spec(tm, c_in)]
    args = [x]
    for w_t, b in zip(w_ts, bs):
        in_specs.append(_resident_spec(w_t.shape))
        in_specs.append(_resident_spec(b.shape))
        args.extend([w_t, b])
    c_out = w_ts[-1].shape[1]
    return pl.pallas_call(
        _make_fused_nobn_kernel(len(w_ts)),
        grid=grid,
        in_specs=in_specs,
        out_specs=_row_spec(tm, c_out),
        out_shape=jax.ShapeDtypeStruct((n, c_out), x.dtype),
        compiler_params=_COMPILER_PARAMS,
    )(*args)


def _forward_bn_fused(x, params, tm):
    """bn=True, whole batch in one row tile: single fused pallas_call."""
    n = x.shape[0]
    w_ts, bs = params["w_t"], params["b"]
    gammas, betas = params["gamma"], params["beta"]
    num_layers = len(w_ts)
    in_specs = [_row_spec(tm, x.shape[1])]
    args = [x]
    for i in range(num_layers):
        in_specs.append(_resident_spec(w_ts[i].shape))
        args.append(w_ts[i])
        if i != num_layers - 1:
            in_specs.append(_resident_spec(gammas[i].shape))
            in_specs.append(_resident_spec(betas[i].shape))
            args.extend([gammas[i], betas[i]])
        else:
            in_specs.append(_resident_spec(bs[i].shape))
            args.append(bs[i])
    c_out = w_ts[-1].shape[1]
    return pl.pallas_call(
        _make_fused_bn_kernel(num_layers, n),
        grid=(1,),
        in_specs=in_specs,
        out_specs=_row_spec(tm, c_out),
        out_shape=jax.ShapeDtypeStruct((n, c_out), x.dtype),
        compiler_params=_COMPILER_PARAMS,
    )(*args)


def _finalize_stats(sums, ssqs, gamma, beta, n_rows):
    """Reduce per-tile partial stats and fold BN into per-channel scale/shift."""
    s = jnp.sum(sums[:, 0, :], axis=0)
    ss = jnp.sum(ssqs[:, 0, :], axis=0)
    mean = s / n_rows
    var = jnp.maximum(ss / n_rows - mean * mean, 0.0)    # biased var (train-mode)
    inv_std = jax.lax.rsqrt(var + BN_EPS)
    scale = gamma * inv_std              # (1, C)
    shift = beta - mean * scale          # (1, C)
    return scale.astype(jnp.float32), shift.astype(jnp.float32)


def _forward_bn_tiled(x, params, tm):
    n = x.shape[0]
    w_ts, bs = params["w_t"], params["b"]
    gammas, betas = params["gamma"], params["beta"]
    num_layers = len(w_ts)
    grid = (pl.cdiv(n, tm),)
    num_tiles = grid[0]

    def stats_spec(c):
        return pl.BlockSpec((1, 1, c), lambda i: (i, 0, 0))

    def stats_shape(c):
        return jax.ShapeDtypeStruct((num_tiles, 1, c), jnp.float32)

    # Layer 0: Linear (hidden-layer bias dropped; BN cancels it) + partial stats.
    w0 = w_ts[0]
    c = w0.shape[1]
    h, sums, ssqs = pl.pallas_call(
        functools.partial(_linear_stats_kernel, n_rows=n, row_tile=tm),
        grid=grid,
        in_specs=[_row_spec(tm, x.shape[1]), _resident_spec(w0.shape)],
        out_specs=[_row_spec(tm, c), stats_spec(c), stats_spec(c)],
        out_shape=[jax.ShapeDtypeStruct((n, c), jnp.float32),
                   stats_shape(c), stats_shape(c)],
        compiler_params=_COMPILER_PARAMS,
    )(x, w0)

    for i in range(1, num_layers):
        scale, shift = _finalize_stats(sums, ssqs, gammas[i - 1], betas[i - 1], n)
        w = w_ts[i]
        c_prev, c = w.shape
        if i < num_layers - 1:
            h, sums, ssqs = pl.pallas_call(
                functools.partial(_bn_act_linear_stats_kernel,
                                  n_rows=n, row_tile=tm),
                grid=grid,
                in_specs=[_row_spec(tm, c_prev), _resident_spec(scale.shape),
                          _resident_spec(shift.shape), _resident_spec(w.shape)],
                out_specs=[_row_spec(tm, c), stats_spec(c), stats_spec(c)],
                out_shape=[jax.ShapeDtypeStruct((n, c), jnp.float32),
                           stats_shape(c), stats_shape(c)],
                compiler_params=_COMPILER_PARAMS,
            )(h, scale, shift, w)
        else:
            return pl.pallas_call(
                _bn_act_linear_bias_kernel,
                grid=grid,
                in_specs=[_row_spec(tm, c_prev), _resident_spec(scale.shape),
                          _resident_spec(shift.shape), _resident_spec(w.shape),
                          _resident_spec(bs[i].shape)],
                out_specs=_row_spec(tm, c),
                out_shape=jax.ShapeDtypeStruct((n, c), x.dtype),
                compiler_params=_COMPILER_PARAMS,
            )(h, scale, shift, w, bs[i])
    return h  # not reached (num_layers == 1 goes through the no-bn path)


def mlp_channels_forward(x, params, *, bn, row_tile=None):
    """Pallas-backed MLPChannels forward.  `params` comes from prepare_params()."""
    w_ts = params["w_t"]
    num_layers = len(w_ts)
    channels = [x.shape[1]] + [w.shape[1] for w in w_ts]
    max_c = max(channels)
    tm = row_tile if row_tile is not None else _pick_row_tile(x.shape[0], max_c)

    if (not bn) or num_layers == 1:
        return _forward_no_bn(x, w_ts, params["b"], tm)

    n = x.shape[0]
    if n <= tm:
        # Whole batch in one tile: fully fused BN kernel if it fits VMEM.
        weight_bytes = sum(int(np.prod(w.shape)) * w.dtype.itemsize for w in w_ts)
        act_bytes = 3 * tm * max_c * 4
        if weight_bytes + act_bytes <= _FUSED_BN_VMEM_BUDGET:
            return _forward_bn_fused(x, params, tm)
    return _forward_bn_tiled(x, params, tm)


# ----------------------------- reference / init ----------------------------


def reference_forward(x, weights, biases, gammas, betas, *, bn):
    """Pure-JAX reference matching the PyTorch module (train-mode BatchNorm)."""
    h = x.astype(jnp.float32)
    num_layers = len(weights)
    for i in range(num_layers):
        h = h @ weights[i].T + biases[i]
        if i != num_layers - 1:
            if bn:
                mean = jnp.mean(h, axis=0, keepdims=True)
                var = jnp.mean((h - mean) ** 2, axis=0, keepdims=True)
                h = (h - mean) / jnp.sqrt(var + BN_EPS) * gammas[i] + betas[i]
            h = jnp.where(h >= 0, h, LEAKY_SLOPE * h)
    return h.astype(x.dtype)


def init_params(key, n_channels):
    """Mimics PyTorch nn.Linear default init (uniform +-1/sqrt(fan_in))."""
    weights, biases, gammas, betas = [], [], [], []
    for i in range(len(n_channels) - 1):
        fan_in, fan_out = n_channels[i], n_channels[i + 1]
        key, kw, kb = jax.random.split(key, 3)
        bound = 1.0 / np.sqrt(fan_in)
        weights.append(
            jax.random.uniform(kw, (fan_out, fan_in), jnp.float32, -bound, bound))
        biases.append(
            jax.random.uniform(kb, (fan_out,), jnp.float32, -bound, bound))
        gammas.append(jnp.ones((fan_out,), jnp.float32))   # BatchNorm1d defaults
        betas.append(jnp.zeros((fan_out,), jnp.float32))
    return weights, biases, gammas, betas


# TODO(synk): BatchNorm1d running_mean/running_var buffer updates are not
# produced (forward-only kernel using train-mode batch statistics).

if __name__ == "__main__":
    n_channels = [4, 32, 32, 8]

    key = jax.random.PRNGKey(0)
    key, kx1, kx2 = jax.random.split(key, 3)
    weights, biases, gammas, betas = init_params(key, n_channels)

    # Small batch -> single-tile fully fused paths (bn=True and bn=False).
    x_small = jax.random.normal(kx1, (8, n_channels[0]), jnp.float32)
    for bn in (True, False):
        params = prepare_params(weights, biases, gammas, betas, bn=bn)
        out = jax.block_until_ready(mlp_channels_forward(x_small, params, bn=bn))
        ref = reference_forward(x_small, weights, biases, gammas, betas, bn=bn)
        np.testing.assert_allclose(np.asarray(out), np.asarray(ref),
                                   rtol=1e-5, atol=1e-5)

    # Larger batch with a forced small row tile -> exercises the multi-tile BN
    # path (per-tile partial stats, masked partial final tile).
    x_big = jax.random.normal(kx2, (40, n_channels[0]), jnp.float32)
    for bn in (True, False):
        params = prepare_params(weights, biases, gammas, betas, bn=bn)
        out = jax.block_until_ready(
            mlp_channels_forward(x_big, params, bn=bn, row_tile=16))
        ref = reference_forward(x_big, weights, biases, gammas, betas, bn=bn)
        np.testing.assert_allclose(np.asarray(out), np.asarray(ref),
                                   rtol=1e-5, atol=1e-5)

    print("KERNEL_OK")
</pallas_src>

<mosaic_0001>
module attributes {stable_mosaic.version = 11 : i64} {
  func.func @kernel(%arg0: i32, %arg1: memref<8x4xf32, #tpu.memory_space<vmem>>, %arg2: memref<4x32xf32, #tpu.memory_space<vmem>>, %arg3: memref<1x32xf32, #tpu.memory_space<vmem>>, %arg4: memref<1x32xf32, #tpu.memory_space<vmem>>, %arg5: memref<32x32xf32, #tpu.memory_space<vmem>>, %arg6: memref<1x32xf32, #tpu.memory_space<vmem>>, %arg7: memref<1x32xf32, #tpu.memory_space<vmem>>, %arg8: memref<32x8xf32, #tpu.memory_space<vmem>>, %arg9: memref<1x8xf32, #tpu.memory_space<vmem>>, %arg10: memref<8x8xf32, #tpu.memory_space<vmem>>) attributes {dimension_semantics = [#tpu.dimension_semantics<parallel>], iteration_bounds = array<i64: 1>, scalar_prefetch = 0 : i64, scratch_operands = 0 : i64, tpu.core_type = #tpu.core_type<tc>, window_params = [{transform_indices = @transform_0, window_bounds = array<i64: 8, 4>}, {pipeline_mode = #tpu.pipeline_mode<synchronous>, transform_indices = @transform_1, window_bounds = array<i64: 4, 32>}, {pipeline_mode = #tpu.pipeline_mode<synchronous>, transform_indices = @transform_2, window_bounds = array<i64: 1, 32>}, {pipeline_mode = #tpu.pipeline_mode<synchronous>, transform_indices = @transform_3, window_bounds = array<i64: 1, 32>}, {pipeline_mode = #tpu.pipeline_mode<synchronous>, transform_indices = @transform_4, window_bounds = array<i64: 32, 32>}, {pipeline_mode = #tpu.pipeline_mode<synchronous>, transform_indices = @transform_5, window_bounds = array<i64: 1, 32>}, {pipeline_mode = #tpu.pipeline_mode<synchronous>, transform_indices = @transform_6, window_bounds = array<i64: 1, 32>}, {pipeline_mode = #tpu.pipeline_mode<synchronous>, transform_indices = @transform_7, window_bounds = array<i64: 32, 8>}, {pipeline_mode = #tpu.pipeline_mode<synchronous>, transform_indices = @transform_8, window_bounds = array<i64: 1, 8>}, {transform_indices = @transform_9, window_bounds = array<i64: 8, 8>}]} {
    %c0 = arith.constant 0 : index
    %c0_0 = arith.constant 0 : index
    %0 = vector.load %arg1[%c0, %c0_0] : memref<8x4xf32, #tpu.memory_space<vmem>>, vector<8x4xf32>
    %c0_1 = arith.constant 0 : index
    %c0_2 = arith.constant 0 : index
    %1 = vector.load %arg2[%c0_1, %c0_2] : memref<4x32xf32, #tpu.memory_space<vmem>>, vector<4x32xf32>
    %cst = arith.constant dense<0.000000e+00> : vector<8x32xf32>
    %2 = tpu.matmul %0, %1, %cst {dimension_numbers = #tpu.dot_dimension_numbers<[1], [0], [0], [1], [0, 0, 1, 1], [], []>} : vector<8x4xf32>, vector<4x32xf32>, vector<8x32xf32> -> vector<8x32xf32>
    %c0_3 = arith.constant 0 : index
    %c0_4 = arith.constant 0 : index
    %3 = vector.load %arg3[%c0_3, %c0_4] : memref<1x32xf32, #tpu.memory_space<vmem>>, vector<1x32xf32>
    %c0_5 = arith.constant 0 : index
    %c0_6 = arith.constant 0 : index
    %4 = vector.load %arg4[%c0_5, %c0_6] : memref<1x32xf32, #tpu.memory_space<vmem>>, vector<1x32xf32>
    %5 = tpu.iota {dimensions = array<i32: 0>} : vector<8x32xi32>
    %c8_i32 = arith.constant 8 : i32
    %6 = vector.broadcast %c8_i32 : i32 to vector<8x32xi32>
    %7 = arith.cmpi slt, %5, %6 : vector<8x32xi32>
    %cst_7 = arith.constant 0.000000e+00 : f32
    %8 = vector.broadcast %cst_7 : f32 to vector<8x32xf32>
    %9 = arith.select %7, %2, %8 : vector<8x32xi1>, vector<8x32xf32>
    %cst_8 = arith.constant dense<0.000000e+00> : vector<32xf32>
    %10 = vector.multi_reduction <add>, %9, %cst_8 [0] : vector<8x32xf32> to vector<32xf32>
    %11 = vector.shape_cast %10 : vector<32xf32> to vector<1x32xf32>
    %cst_9 = arith.constant 1.250000e-01 : f32
    %12 = vector.broadcast %cst_9 : f32 to vector<1x32xf32>
    %13 = arith.mulf %11, %12 : vector<1x32xf32>
    %14 = arith.mulf %9, %9 : vector<8x32xf32>
    %cst_10 = arith.constant dense<0.000000e+00> : vector<32xf32>
    %15 = vector.multi_reduction <add>, %14, %cst_10 [0] : vector<8x32xf32> to vector<32xf32>
    %16 = vector.shape_cast %15 : vector<32xf32> to vector<1x32xf32>
    %cst_11 = arith.constant 1.250000e-01 : f32
    %17 = vector.broadcast %cst_11 : f32 to vector<1x32xf32>
    %18 = arith.mulf %16, %17 : vector<1x32xf32>
    %19 = arith.mulf %13, %13 : vector<1x32xf32>
    %20 = arith.subf %18, %19 : vector<1x32xf32>
    %cst_12 = arith.constant 0.000000e+00 : f32
    %21 = vector.broadcast %cst_12 : f32 to vector<1x32xf32>
    %22 = arith.maximumf %20, %21 : vector<1x32xf32>
    %cst_13 = arith.constant 9.99999974E-6 : f32
    %23 = vector.broadcast %cst_13 : f32 to vector<1x32xf32>
    %24 = arith.addf %22, %23 : vector<1x32xf32>
    %25 = math.rsqrt %24 : vector<1x32xf32>
    %26 = arith.mulf %3, %25 : vector<1x32xf32>
    %27 = vector.broadcast %13 : vector<1x32xf32> to vector<8x32xf32>
    %28 = arith.subf %2, %27 : vector<8x32xf32>
    %29 = vector.broadcast %26 : vector<1x32xf32> to vector<8x32xf32>
    %30 = arith.mulf %28, %29 : vector<8x32xf32>
    %31 = vector.broadcast %4 : vector<1x32xf32> to vector<8x32xf32>
    %32 = arith.addf %30, %31 : vector<8x32xf32>
    %cst_14 = arith.constant 2.000000e-01 : f32
    %33 = vector.broadcast %cst_14 : f32 to vector<8x32xf32>
    %34 = arith.mulf %33, %32 : vector<8x32xf32>
    %35 = arith.maximumf %32, %34 : vector<8x32xf32>
    %c0_15 = arith.constant 0 : index
    %c0_16 = arith.constant 0 : index
    %36 = vector.load %arg5[%c0_15, %c0_16] : memref<32x32xf32, #tpu.memory_space<vmem>>, vector<32x32xf32>
    %cst_17 = arith.constant dense<0.000000e+00> : vector<8x32xf32>
    %37 = tpu.matmul %35, %36, %cst_17 {dimension_numbers = #tpu.dot_dimension_numbers<[1], [0], [0], [1], [0, 0, 1, 1], [], []>} : vector<8x32xf32>, vector<32x32xf32>, vector<8x32xf32> -> vector<8x32xf32>
    %c0_18 = arith.constant 0 : index
    %c0_19 = arith.constant 0 : index
    %38 = vector.load %arg6[%c0_18, %c0_19] : memref<1x32xf32, #tpu.memory_space<vmem>>, vector<1x32xf32>
    %c0_20 = arith.constant 0 : index
    %c0_21 = arith.constant 0 : index
    %39 = vector.load %arg7[%c0_20, %c0_21] : memref<1x32xf32, #tpu.memory_space<vmem>>, vector<1x32xf32>
    %40 = tpu.iota {dimensions = array<i32: 0>} : vector<8x32xi32>
    %c8_i32_22 = arith.constant 8 : i32
    %41 = vector.broadcast %c8_i32_22 : i32 to vector<8x32xi32>
    %42 = arith.cmpi slt, %40, %41 : vector<8x32xi32>
    %cst_23 = arith.constant 0.000000e+00 : f32
    %43 = vector.broadcast %cst_23 : f32 to vector<8x32xf32>
    %44 = arith.select %42, %37, %43 : vector<8x32xi1>, vector<8x32xf32>
    %cst_24 = arith.constant dense<0.000000e+00> : vector<32xf32>
    %45 = vector.multi_reduction <add>, %44, %cst_24 [0] : vector<8x32xf32> to vector<32xf32>
    %46 = vector.shape_cast %45 : vector<32xf32> to vector<1x32xf32>
    %cst_25 = arith.constant 1.250000e-01 : f32
    %47 = vector.broadcast %cst_25 : f32 to vector<1x32xf32>
    %48 = arith.mulf %46, %47 : vector<1x32xf32>
    %49 = arith.mulf %44, %44 : vector<8x32xf32>
    %cst_26 = arith.constant dense<0.000000e+00> : vector<32xf32>
    %50 = vector.multi_reduction <add>, %49, %cst_26 [0] : vector<8x32xf32> to vector<32xf32>
    %51 = vector.shape_cast %50 : vector<32xf32> to vector<1x32xf32>
    %cst_27 = arith.constant 1.250000e-01 : f32
    %52 = vector.broadcast %cst_27 : f32 to vector<1x32xf32>
    %53 = arith.mulf %51, %52 : vector<1x32xf32>
    %54 = arith.mulf %48, %48 : vector<1x32xf32>
    %55 = arith.subf %53, %54 : vector<1x32xf32>
    %cst_28 = arith.constant 0.000000e+00 : f32
    %56 = vector.broadcast %cst_28 : f32 to vector<1x32xf32>
    %57 = arith.maximumf %55, %56 : vector<1x32xf32>
    %cst_29 = arith.constant 9.99999974E-6 : f32
    %58 = vector.broadcast %cst_29 : f32 to vector<1x32xf32>
    %59 = arith.addf %57, %58 : vector<1x32xf32>
    %60 = math.rsqrt %59 : vector<1x32xf32>
    %61 = arith.mulf %38, %60 : vector<1x32xf32>
    %62 = vector.broadcast %48 : vector<1x32xf32> to vector<8x32xf32>
    %63 = arith.subf %37, %62 : vector<8x32xf32>
    %64 = vector.broadcast %61 : vector<1x32xf32> to vector<8x32xf32>
    %65 = arith.mulf %63, %64 : vector<8x32xf32>
    %66 = vector.broadcast %39 : vector<1x32xf32> to vector<8x32xf32>
    %67 = arith.addf %65, %66 : vector<8x32xf32>
    %cst_30 = arith.constant 2.000000e-01 : f32
    %68 = vector.broadcast %cst_30 : f32 to vector<8x32xf32>
    %69 = arith.mulf %68, %67 : vector<8x32xf32>
    %70 = arith.maximumf %67, %69 : vector<8x32xf32>
    %c0_31 = arith.constant 0 : index
    %c0_32 = arith.constant 0 : index
    %71 = vector.load %arg8[%c0_31, %c0_32] : memref<32x8xf32, #tpu.memory_space<vmem>>, vector<32x8xf32>
    %cst_33 = arith.constant dense<0.000000e+00> : vector<8x8xf32>
    %72 = tpu.matmul %70, %71, %cst_33 {dimension_numbers = #tpu.dot_dimension_numbers<[1], [0], [0], [1], [0, 0, 1, 1], [], []>} : vector<8x32xf32>, vector<32x8xf32>, vector<8x8xf32> -> vector<8x8xf32>
    %c0_34 = arith.constant 0 : index
    %c0_35 = arith.constant 0 : index
    %73 = vector.load %arg9[%c0_34, %c0_35] : memref<1x8xf32, #tpu.memory_space<vmem>>, vector<1x8xf32>
    %74 = vector.broadcast %73 : vector<1x8xf32> to vector<8x8xf32>
    %75 = arith.addf %72, %74 : vector<8x8xf32>
    %c0_36 = arith.constant 0 : index
    %c0_37 = arith.constant 0 : index
    %76 = vector.load %arg10[%c0_36, %c0_37] : memref<8x8xf32, #tpu.memory_space<vmem>>, vector<8x8xf32>
    tpu.vector_store %arg10[%c0_36, %c0_37], %75 {strides = array<i32>} : memref<8x8xf32, #tpu.memory_space<vmem>>, vector<8x8xf32>,
    return
  }
  func.func @transform_0(%arg0: i32) -> (i32, i32) {
    %c0_i32 = arith.constant 0 : i32
    %c0_i32_0 = arith.constant 0 : i32
    return %arg0, %c0_i32 : i32, i32
  }
  func.func @transform_1(%arg0: i32) -> (i32, i32) {
    %c0_i32 = arith.constant 0 : i32
    %c0_i32_0 = arith.constant 0 : i32
    %c0_i32_1 = arith.constant 0 : i32
    return %c0_i32, %c0_i32_0 : i32, i32
  }
  func.func @transform_2(%arg0: i32) -> (i32, i32) {
    %c0_i32 = arith.constant 0 : i32
    %c0_i32_0 = arith.constant 0 : i32
    %c0_i32_1 = arith.constant 0 : i32
    return %c0_i32, %c0_i32_0 : i32, i32
  }
  func.func @transform_3(%arg0: i32) -> (i32, i32) {
    %c0_i32 = arith.constant 0 : i32
    %c0_i32_0 = arith.constant 0 : i32
    %c0_i32_1 = arith.constant 0 : i32
    return %c0_i32, %c0_i32_0 : i32, i32
  }
  func.func @transform_4(%arg0: i32) -> (i32, i32) {
    %c0_i32 = arith.constant 0 : i32
    %c0_i32_0 = arith.constant 0 : i32
    %c0_i32_1 = arith.constant 0 : i32
    return %c0_i32, %c0_i32_0 : i32, i32
  }
  func.func @transform_5(%arg0: i32) -> (i32, i32) {
    %c0_i32 = arith.constant 0 : i32
    %c0_i32_0 = arith.constant 0 : i32
    %c0_i32_1 = arith.constant 0 : i32
    return %c0_i32, %c0_i32_0 : i32, i32
  }
  func.func @transform_6(%arg0: i32) -> (i32, i32) {
    %c0_i32 = arith.constant 0 : i32
    %c0_i32_0 = arith.constant 0 : i32
    %c0_i32_1 = arith.constant 0 : i32
    return %c0_i32, %c0_i32_0 : i32, i32
  }
  func.func @transform_7(%arg0: i32) -> (i32, i32) {
    %c0_i32 = arith.constant 0 : i32
    %c0_i32_0 = arith.constant 0 : i32
    %c0_i32_1 = arith.constant 0 : i32
    return %c0_i32, %c0_i32_0 : i32, i32
  }
  func.func @transform_8(%arg0: i32) -> (i32, i32) {
    %c0_i32 = arith.constant 0 : i32
    %c0_i32_0 = arith.constant 0 : i32
    %c0_i32_1 = arith.constant 0 : i32
    return %c0_i32, %c0_i32_0 : i32, i32
  }
  func.func @transform_9(%arg0: i32) -> (i32, i32) {
    %c0_i32 = arith.constant 0 : i32
    %c0_i32_0 = arith.constant 0 : i32
    return %arg0, %c0_i32 : i32, i32
  }
}

</mosaic_0001>

<bundles_post_ra>
// kernel: tpu_custom_call.1
= control target key start
LH: loop header
LB: loop body
LE: loop exit
PB: predicated region body
PF: predicated region fallthrough
CT: control target
= control target key end

     0   :  { %vm39_vm0 = vcmask 1043456   ;;  %v470_v2 = vmov 0.0   ;;  %vm471_vm1 = vmmov 0   ;;  %vm35_vm2 = vcmask 31744   ;;  %s587_s0 = inlined_call_operand.vmem [shape: f32[8,4], index: 0, kind: input, shape index: {}]   ;;  %s588_s1 = inlined_call_operand.vmem [shape: f32[4,32], index: 1, kind: input, shape index: {}]   ;;  %s589_s2 = inlined_call_operand.vmem [shape: f32[1,32], index: 2, kind: input, shape index: {}]   ;;  %s590_s3 = inlined_call_operand.vmem [shape: f32[1,32], index: 3, kind: input, shape index: {}]   ;;  %s591_s4 = inlined_call_operand.vmem [shape: f32[32,32], index: 4, kind: input, shape index: {}]   ;;  %s592_s5 = inlined_call_operand.vmem [shape: f32[1,32], index: 5, kind: input, shape index: {}]   ;;  %s593_s6 = inlined_call_operand.vmem [shape: f32[1,32], index: 6, kind: input, shape index: {}]   ;;  %s594_s7 = inlined_call_operand.vmem [shape: f32[32,8], index: 7, kind: input, shape index: {}]   ;;  %s595_s8 = inlined_call_operand.vmem [shape: f32[1,8], index: 8, kind: input, shape index: {}]   ;;  %s596_s9 = inlined_call_operand.hbm [shape: f32[8,8], index: 9, kind: output, shape index: {}]  }
   0x1   :  { %v34_v0 = vld [vmem:[%s588_s1] sm:$0xf]  ;;  %399 = vmatprep.subr.mxu0 %v470_v2  ;;  %401 = vmatprep.mubr.msk.f32.mxu0 %vm471_vm1, %v470_v2 }
   0x2   :  { %v33_v1 = vld [vmem:[%s587_s0] sm:$0xff] }
   0x3   :  { %14 = vsyncpa [#allocation3], 0  ;;  %400 = vmatpush3.msk.msra.mxu0 %vm39_vm0, %v34_v0  ;;  %412 = vmatprep.mubr.msk.f32.mxu1 %vm471_vm1, %v470_v2  ;;  %v160_v3 = vld [vmem:[%s591_s4] sm:$0xff]  ;;  %v161_v4 = vld [vmem:[%s591_s4 + $0x8] sm:$0xff]  ;;  %v472_v6 = vmov 0.0|0.0   ;;  %vm119_vm3 = vcmask 261120   ;;  %v145_v33 = vlaneseq }
   0x4   :  { %402 = vmatmul.mubr.msk.f32.vlgmr.msra.gmra.mrb[0].mxu0 %vm35_vm2, %v33_v1  ;;  %v427_v5 = vpack.c.bf16 %v161_v4, %v160_v3  ;;  %426 = vmatprep.subr.bf16.mxu1 %v472_v6  ;;  %v162_v7 = vld [vmem:[%s591_s4 + $0x10] sm:$0xff]  ;;  %v163_v8 = vld [vmem:[%s591_s4 + $0x18] sm:$0xff]  ;;  %v113_v35 = vld [vmem:[%s589_s2] sm:$0x1]  ;;  %s473_s12 = smov [#allocation2]   ;;  %vm364_vm4 = vcmask 64512  }
   0x5   :  { %423 = vmatprep.mubr.msk.f32.mxu0 %vm471_vm1, %v470_v2  ;;  %432 = vmatprep.subr.bf16.mxu0 %v472_v6  ;;  %v430_v9 = vpack.c.bf16 %v163_v8, %v162_v7  ;;  %v146_v34 = vshrl.u32 %v145_v33, 7  ;;  %v382_v41 = vld [vmem:[%s590_s3] ss:$0 sm:$0xff]  ;;  %v281_v47 = vld [vmem:[%s594_s7 + $0x8] sm:$0xff]  ;;  %v282_v49 = vld [vmem:[%s594_s7 + $0x10] sm:$0xff] }
   0x6   :  { %428 = vmatpush3.bf16.msra.mxu1 %v427_v5  ;;  %v280_v46 = vld [vmem:[%s594_s7] sm:$0xff]  ;;  %v283_v50 = vld [vmem:[%s594_s7 + $0x18] sm:$0xff] }
   0x7   :  { %429 = vmatprep.subr.bf16.mxu1 %v472_v6  ;;  %v147_v36 = vsub.s32 0, %v146_v34  ;;  %v433_v48 = vpack.c.bf16 %v281_v47, %v280_v46  ;;  %v436_v51 = vpack.c.bf16 %v283_v50, %v282_v49 }
   0x9   :  { %434 = vmatpush3.bf16.msra.mxu0 %v433_v48 }
   0xa   :  { %431 = vmatpush3.bf16.msra.mxu1 %v430_v9  ;;  %435 = vmatprep.subr.bf16.mxu0 %v472_v6 }
   0xd   :  { %437 = vmatpush3.bf16.msra.mxu0 %v436_v51 }
  0xd7   :  { %v109_v10 = vpop.f32.mrb[0].mxu0 }
  0xd8   :  { %v120_v11 = vsel %vm119_vm3, %v109_v10, 0.0  ;;  %v128_v12 = vmul.f32 %v109_v10, %v109_v10  ;;  %v403_v13 = vpop.f32.mrb[1].mxu0 }
  0xd9   :  { %v121_v14 = vrot.slane %v120_v11, 4 }
  0xda   :  { %v129_v15 = vsel %vm119_vm3, %v128_v12, 0.0 }
  0xdb   :  { %v122_v16 = vadd.f32 %v121_v14, %v120_v11  ;;  %v130_v17 = vrot.slane %v129_v15, 4  ;;  %v237_v11 = vld [vmem:[%s592_s5] sm:$0x1]  ;;  %s372_s5 = sshll.u32 %s473_s12, 4  ;;  %s373_s5 = int_to_ptr.vmem [resolvable:$true] %s372_s5 }
  0xdc   :  { %s446_s13 = scalar_lea.vmem %s373_s5, 128  ;;  %p451_p1 = scmp.lt.s32.totalorder %s373_s5, %s373_s5 }
  0xdd   :  { %v123_v18 = vrot.slane %v122_v16, 2  ;;  %v131_v19 = vadd.f32 %v130_v17, %v129_v15  ;;  %p447_p0 = scmp.ne.s32.totalorder %s373_s5, %s446_s13  ;;  %p452_p2 = scmp.lt.s32.totalorder %s446_s13, %s446_s13 }
  0xdf   :  { %v124_v20 = vadd.f32 %v123_v18, %v122_v16  ;;  %v132_v21 = vrot.slane %v131_v19, 2  ;;  %v384_v16 = vld [vmem:[%s593_s6] ss:$0 sm:$0xff]  ;;  %p453_p3 = por %p452_p2, %p451_p1 }
  0xe1   :  { %v125_v22 = vrot.slane %v124_v20, 1  ;;  %v133_v23 = vadd.f32 %v132_v21, %v131_v19  ;;  %v385_v21 = vld [vmem:[%s595_s8] ss:$0 sm:$0xff]  ;;  %p454_p4 = pnand %p453_p3, %p447_p0 }
  0xe3   :  { %v126_v24 = vadd.f32 %v125_v22, %v124_v20  ;;  %v134_v25 = vrot.slane %v133_v23, 1 }
  0xe5   :  { %v127_v26 = vmul.f32 0.125, %v126_v24  ;;  %v135_v27 = vadd.f32 %v134_v25, %v133_v23 }
  0xe7   :  { %v136_v28 = vmul.f32 0.125, %v135_v27  ;;  %v137_v29 = vmul.f32 %v127_v26, %v127_v26  ;;  %v143_v39 = vsub.f32 %v109_v10, %v127_v26 }
  0xe9   :  { %v138_v30 = vsub.f32 %v136_v28, %v137_v29 }
  0xeb   :  { %v139_v31 = vmax.f32 %v138_v30, 0.0 }
  0xed   :  { %v140_v32 = vadd.f32 1e-05, %v139_v31 }
  0xef   :  { %442 = vrsqrt.f32 %v140_v32 }
  0xf9   :  { %v443_v37 = vpop.eup %442 }
  0xfa   :  { %v142_v38 = vmul.f32 %v443_v37, %v113_v35 }
  0xfc   :  { %v148_v40 = vrot.slane %v142_v38, %v147_v36 }
  0xfe   :  { %v150_v42 = vmul.f32 %v148_v40, %v143_v39 }
 0x100   :  { %v157_v43 = vadd.f32 %v382_v41, %v150_v42 }
 0x102   :  { %v158_v44 = vmul.f32 0.2, %v157_v43 }
 0x104   :  { %v159_v45 = vmax.f32 %v157_v43, %v158_v44 }
 0x106   :  { %413 = vmatmul.mubr.msk.f32.vlgmr.msra.gmra.mrb[0].mxu1 %vm119_vm3, %v159_v45 }
 0x1d9   :  { %v233_v52 = vpop.f32.mrb[0].mxu1 }
 0x1da   :  { %v240_v53 = vsel %vm119_vm3, %v233_v52, 0.0  ;;  %v248_v54 = vmul.f32 %v233_v52, %v233_v52  ;;  %v414_v55 = vpop.f32.mrb[1].mxu1 }
 0x1db   :  { %v241_v56 = vrot.slane %v240_v53, 4 }
 0x1dc   :  { %v249_v57 = vsel %vm119_vm3, %v248_v54, 0.0 }
 0x1dd   :  { %v242_v58 = vadd.f32 %v241_v56, %v240_v53  ;;  %v250_v59 = vrot.slane %v249_v57, 4 }
 0x1df   :  { %v243_v60 = vrot.slane %v242_v58, 2  ;;  %v251_v61 = vadd.f32 %v250_v59, %v249_v57 }
 0x1e1   :  { %v244_v62 = vadd.f32 %v243_v60, %v242_v58  ;;  %v252_v63 = vrot.slane %v251_v61, 2 }
 0x1e3   :  { %v245_v0 = vrot.slane %v244_v62, 1  ;;  %v253_v1 = vadd.f32 %v252_v63, %v251_v61 }
 0x1e5   :  { %v246_v2 = vadd.f32 %v245_v0, %v244_v62  ;;  %v254_v3 = vrot.slane %v253_v1, 1 }
 0x1e7   :  { %v247_v4 = vmul.f32 0.125, %v246_v2  ;;  %v255_v5 = vadd.f32 %v254_v3, %v253_v1 }
 0x1e9   :  { %v256_v6 = vmul.f32 0.125, %v255_v5  ;;  %v257_v7 = vmul.f32 %v247_v4, %v247_v4  ;;  %v263_v14 = vsub.f32 %v233_v52, %v247_v4 }
 0x1eb   :  { %v258_v8 = vsub.f32 %v256_v6, %v257_v7 }
 0x1ed   :  { %v259_v9 = vmax.f32 %v258_v8, 0.0 }
 0x1ef   :  { %v260_v10 = vadd.f32 1e-05, %v259_v9 }
 0x1f1   :  { %444 = vrsqrt.f32 %v260_v10 }
 0x1fb   :  { %v445_v12 = vpop.eup %444 }
 0x1fc   :  { %v262_v13 = vmul.f32 %v445_v12, %v237_v11 }
 0x1fe   :  { %v268_v15 = vrot.slane %v262_v13, %v147_v36 }
 0x200   :  { %v270_v17 = vmul.f32 %v268_v15, %v263_v14 }
 0x202   :  { %v277_v18 = vadd.f32 %v384_v16, %v270_v17 }
 0x204   :  { %v278_v19 = vmul.f32 0.2, %v277_v18 }
 0x206   :  { %v279_v20 = vmax.f32 %v277_v18, %v278_v19 }
 0x208   :  { %424 = vmatmul.mubr.msk.f32.vlgmr.msra.gmra.mrb[2].mxu0 %vm119_vm3, %v279_v20 }
 0x2db   :  { %v360_v22 = vpop.f32.mrb[2].mxu0 }
 0x2dc   :  { %v361_v23 = vadd.f32 %v385_v21, %v360_v22  ;;  %v425_v24 = vpop.f32.mrb[3].mxu0 }
 0x2de   :  { %365 = vst.msk [vmem:[#allocation2] sm:$0xff] %vm364_vm4, %v361_v23 }
 0x2df   :  { %457 = shalt.err (!%p454_p4)
}
 0x2e0   :  { %s458_s1 = scalar_lea.hbm %s596_s9, 128 }
 0x2e1   :  { %p459_p5 = scmp.ne.s32.totalorder %s596_s9, %s458_s1  ;;  %p462_p6 = scmp.lt.u32.totalorder %s458_s1, %s596_s9 }
 0x2e3   :  { %p464_p7 = pnand %p462_p6, %p459_p5 }
 0x2e5   :  { %467 = shalt.err (!%p464_p7)
}
 0x2e6   :  { %375 = dma.vmem_to_hbm [thread:$0]  %s373_s5, 128, %s596_s9, [#allocation3]  }
 0x2e7   :  { %468 = dma.done.wait [#allocation3], 128  }
 0x2e8   :  { %469 = vsyncadd [#allocation3], 4294967168 }
 0x2e9   :  { %379 = vsyncpa [#allocation3], 1 }

</bundles_post_ra>
